<compile_context>
chip_gen: v7x
topology: tpu7x:2x2x1
jax: 0.10.0
libtpu: 0.0.40
codegen_flags: <defaults>
</compile_context>

<pallas_src>
import functools

import jax
import jax.numpy as jnp
from jax.experimental import pallas as pl
from jax.experimental.pallas import tpu as pltpu


def _round_up(x, m):
    return -(-x // m) * m


def _dwconv1d_kernel(x_ref, w_ref, o_ref, xpad_ref, *,
                     kernel_size, padding, l_in, l_out, tl, halo, sub):
    """Depthwise 1D conv (stride 1) for one (channel-tile, batch) block.

    x_ref:    (1, TC, L)     input block (native dtype)
    w_ref:    (TC, K)        depthwise filters
    o_ref:    (1, TC, L_out) output block
    xpad_ref: (TC, Wpad)     VMEM scratch holding the zero-padded input row
    """
    tc, wpad = xpad_ref.shape
    tlw = tl + halo                      # working width of one time chunk
    n_chunks = -(-l_out // tl)           # static
    w_all = w_ref[...].astype(jnp.float32)            # (TC, K), tiny

    # ---- Phase 1: build the zero-padded input once in VMEM ------------------
    # Pads are written as zeros and the data copied in; this replaces the
    # per-tap boundary masks of the previous version with a single VMEM pass.
    for r0 in range(0, tc, sub):
        if padding > 0:
            xpad_ref[r0:r0 + sub, :padding] = jnp.zeros(
                (sub, padding), xpad_ref.dtype)
        for cs in range(0, l_in, tl):                  # bounded-size copies
            w_ = min(tl, l_in - cs)
            xpad_ref[r0:r0 + sub, padding + cs:padding + cs + w_] = \
                x_ref[0, r0:r0 + sub, cs:cs + w_]
        right0 = padding + l_in
        if wpad > right0:
            xpad_ref[r0:r0 + sub, right0:] = jnp.zeros(
                (sub, wpad - right0), xpad_ref.dtype)

    # ---- Phase 2: taps as lane-rolls + FMA on register-resident chunks ------
    # For output positions j of a chunk starting at cs:
    #   y[cs + j] = sum_k w[k] * xpad[cs + j + k]
    # The chunk is read once (aligned, native dtype) and rolled K times; the
    # roll wrap-around only touches lanes >= l_out - cs, which are never stored.
    for r0 in range(0, tc, sub):
        for ci in range(n_chunks):
            cs = ci * tl
            out_w = min(tl, l_out - cs)
            chunk = xpad_ref[r0:r0 + sub, cs:cs + tlw]       # (sub, tlw)
            acc = jnp.zeros((sub, tlw), jnp.float32)
            for k in range(kernel_size):                     # K small & static
                xk = pltpu.roll(chunk, shift=(-k) % tlw, axis=1) if k else chunk
                wk = w_all[r0:r0 + sub, k:k + 1]             # (sub, 1)
                # TODO(synk): on v6e/v7x a packed-bf16 multiply (f32 add only)
                # would halve VALU work for bf16 inputs; kept f32 math for
                # accuracy/simplicity.
                acc = acc + xk.astype(jnp.float32) * wk
            o_ref[0, r0:r0 + sub, cs:cs + out_w] = \
                acc[:, :out_w].astype(o_ref.dtype)


def _choose_tiles(c, l_in, l_out, k, itemsize, budget_bytes):
    """Pick (channel tile, channel sub-tile, time chunk, halo, scratch width)."""
    tl = min(512, _round_up(max(l_out, 1), 128))       # 128-aligned time chunk
    halo = _round_up(max(k - 1, 1), 128)               # covers the K-1 tap reach
    n_chunks = -(-l_out // tl)
    wpad = n_chunks * tl + halo                        # >= padding + l_in

    if c <= 8:
        tc = c                                         # full-channel block
    else:
        m = 16 if itemsize <= 2 else 8                 # bf16 sublane packing
        tc = max(min((c // m) * m, 256), m)

        def vmem_bytes(t):
            # double-buffered in/out blocks + padded scratch + small working set
            return itemsize * t * (2 * l_in + 2 * l_out + wpad) + (64 << 10)

        while tc > m and vmem_bytes(tc) > budget_bytes:
            tc -= m
        # Bound static unrolling (sub-rows x time-chunks) for very long L.
        # TODO(synk): for very long sequences, tile time on a grid axis with a
        # K-1 halo instead of shrinking the channel tile.
        while tc > m and (tc // 8) * n_chunks > 128:
            tc -= m

    sub = 16 if tc % 16 == 0 else (8 if tc % 8 == 0 else tc)
    return tc, sub, tl, halo, wpad


def depthwise_conv1d(x, weight, *, padding, stride):
    """x: (N, C, L), weight: (C, 1, K) -> (N, C, L_out). PyTorch Conv1d(groups=C)."""
    n, c, l_in = x.shape
    assert weight.shape[0] == c and weight.shape[1] == 1
    k = weight.shape[-1]
    l_out = (l_in + 2 * padding - k) // stride + 1
    assert l_out > 0, f"degenerate config: l_out={l_out}"

    if stride > 1:
        # TODO(synk): strided depthwise conv is rare in Conformer; reuse the
        # optimized stride-1 kernel and subsample (over-computes by `stride`).
        # A phase-decomposed in-kernel path would avoid the extra work.
        y_full = depthwise_conv1d(x, weight, padding=padding, stride=1)
        return y_full[:, :, ::stride][:, :, :l_out]

    # Generation-aware VMEM budget (64 MiB physical on v7x vs 128 MiB v5e/v6e).
    try:
        vmem_cap = pltpu.get_tpu_info().vmem_capacity_bytes
    except Exception:
        vmem_cap = 64 << 20
    vmem_limit = min(40 << 20, vmem_cap // 2)
    budget = vmem_limit // 2

    w_ck = weight[:, 0, :]                              # (C, K), tiny
    itemsize = x.dtype.itemsize
    tc, sub, tl, halo, wpad = _choose_tiles(c, l_in, l_out, k, itemsize, budget)
    grid = (pl.cdiv(c, tc), n)                          # batch innermost:
                                                        # weight block reused

    kernel = functools.partial(
        _dwconv1d_kernel, kernel_size=k, padding=padding,
        l_in=l_in, l_out=l_out, tl=tl, halo=halo, sub=sub)

    bytes_accessed = (x.size * itemsize
                      + w_ck.size * w_ck.dtype.itemsize
                      + n * c * l_out * itemsize)

    # Note: if C is not a multiple of tc, the ragged last block computes on
    # padded garbage sublanes; those rows are discarded by Pallas on store.
    return pl.pallas_call(
        kernel,
        out_shape=jax.ShapeDtypeStruct((n, c, l_out), x.dtype),
        grid=grid,
        in_specs=[
            pl.BlockSpec((1, tc, l_in), lambda cc, b: (b, cc, 0)),
            pl.BlockSpec((tc, k), lambda cc, b: (cc, 0)),
        ],
        out_specs=pl.BlockSpec((1, tc, l_out), lambda cc, b: (b, cc, 0)),
        scratch_shapes=[pltpu.VMEM((tc, wpad), x.dtype)],
        compiler_params=pltpu.CompilerParams(
            dimension_semantics=("parallel", "parallel"),
            vmem_limit_bytes=vmem_limit,
        ),
        cost_estimate=pl.CostEstimate(
            flops=2 * n * c * l_out * k,
            transcendentals=0,
            bytes_accessed=bytes_accessed),
    )(x, w_ck)


def _reference(x, weight, *, padding, stride):
    c = x.shape[1]
    return jax.lax.conv_general_dilated(
        x.astype(jnp.float32), weight.astype(jnp.float32),
        window_strides=(stride,),
        padding=[(padding, padding)],
        dimension_numbers=("NCH", "OIH", "NCH"),
        feature_group_count=c,
    )


if __name__ == "__main__":
    key = jax.random.PRNGKey(0)
    # (N, C, L, K, padding, stride, dtype) — Conformer-style depthwise configs.
    configs = [
        (2, 8, 256, 3, 1, 1, jnp.float32),     # 'same' padding, typical usage
        (2, 4, 128, 7, 3, 1, jnp.float32),     # C < 8 (full-channel block)
        (2, 32, 300, 31, 15, 1, jnp.float32),  # Conformer K=31, ragged L
        (2, 16, 128, 3, 1, 2, jnp.float32),    # strided variant
        (2, 32, 256, 15, 7, 1, jnp.bfloat16),  # bf16: packed rolls, 16-row tiles
    ]
    for (n, c, l, ksz, pad, strd, dt) in configs:
        key, kx, kw = jax.random.split(key, 3)
        x = jax.random.normal(kx, (n, c, l), dtype=jnp.float32).astype(dt)
        # PyTorch Conv1d weight shape with groups=C: (out_channels=C, 1, K)
        weight = jax.random.normal(kw, (c, 1, ksz), dtype=jnp.float32).astype(dt)

        y = depthwise_conv1d(x, weight, padding=pad, stride=strd)
        jax.block_until_ready(y)

        y_ref = _reference(x, weight, padding=pad, stride=strd)
        assert y.shape == y_ref.shape, (y.shape, y_ref.shape)
        atol, rtol = (1e-4, 1e-5) if dt == jnp.float32 else (5e-2, 2e-2)
        assert jnp.allclose(y.astype(jnp.float32), y_ref, atol=atol, rtol=rtol), \
            (n, c, l, ksz, pad, strd, dt)

    print("KERNEL_OK")
</pallas_src>

<mosaic_0001>
module attributes {stable_mosaic.version = 11 : i64} {
  func.func @_dwconv1d_kernel(%arg0: i32, %arg1: i32, %arg2: memref<1x8x256xf32, #tpu.memory_space<vmem>>, %arg3: memref<8x3xf32, #tpu.memory_space<vmem>>, %arg4: memref<1x8x256xf32, #tpu.memory_space<vmem>>, %arg5: memref<8x384xf32, #tpu.memory_space<vmem>>) attributes {dimension_semantics = [#tpu.dimension_semantics<parallel>, #tpu.dimension_semantics<parallel>], iteration_bounds = array<i64: 1, 2>, scalar_prefetch = 0 : i64, scratch_operands = 1 : i64, tpu.core_type = #tpu.core_type<tc>, window_params = [{transform_indices = @transform_0, window_bounds = array<i64: 1, 8, 256>}, {transform_indices = @transform_1, window_bounds = array<i64: 8, 3>}, {transform_indices = @transform_2, window_bounds = array<i64: 1, 8, 256>}]} {
    %c0 = arith.constant 0 : index
    %c0_0 = arith.constant 0 : index
    %0 = vector.load %arg3[%c0, %c0_0] : memref<8x3xf32, #tpu.memory_space<vmem>>, vector<8x3xf32>
    %cst = arith.constant 0.000000e+00 : f32
    %1 = vector.broadcast %cst : f32 to vector<8x1xf32>
    %c0_1 = arith.constant 0 : index
    %c0_2 = arith.constant 0 : index
    %2 = vector.load %arg5[%c0_1, %c0_2] : memref<8x384xf32, #tpu.memory_space<vmem>>, vector<8x1xf32>
    tpu.vector_store %arg5[%c0_1, %c0_2], %1 {strides = array<i32>} : memref<8x384xf32, #tpu.memory_space<vmem>>, vector<8x1xf32>,
    %c0_3 = arith.constant 0 : index
    %c0_4 = arith.constant 0 : index
    %c0_5 = arith.constant 0 : index
    %3 = vector.load %arg2[%c0_3, %c0_4, %c0_5] : memref<1x8x256xf32, #tpu.memory_space<vmem>>, vector<1x8x256xf32>
    %4 = vector.shape_cast %3 : vector<1x8x256xf32> to vector<8x256xf32>
    %c0_6 = arith.constant 0 : index
    %c1 = arith.constant 1 : index
    %5 = vector.load %arg5[%c0_6, %c1] : memref<8x384xf32, #tpu.memory_space<vmem>>, vector<8x256xf32>
    tpu.vector_store %arg5[%c0_6, %c1], %4 {strides = array<i32>} : memref<8x384xf32, #tpu.memory_space<vmem>>, vector<8x256xf32>,
    %cst_7 = arith.constant 0.000000e+00 : f32
    %6 = vector.broadcast %cst_7 : f32 to vector<8x127xf32>
    %c0_8 = arith.constant 0 : index
    %c257 = arith.constant 257 : index
    %7 = vector.load %arg5[%c0_8, %c257] : memref<8x384xf32, #tpu.memory_space<vmem>>, vector<8x127xf32>
    tpu.vector_store %arg5[%c0_8, %c257], %6 {strides = array<i32>} : memref<8x384xf32, #tpu.memory_space<vmem>>, vector<8x127xf32>,
    %c0_9 = arith.constant 0 : index
    %c0_10 = arith.constant 0 : index
    %8 = vector.load %arg5[%c0_9, %c0_10] : memref<8x384xf32, #tpu.memory_space<vmem>>, vector<8x384xf32>
    %cst_11 = arith.constant 0.000000e+00 : f32
    %9 = vector.broadcast %cst_11 : f32 to vector<8x384xf32>
    %10 = vector.extract_strided_slice %0 {offsets = [0, 0], sizes = [8, 1], strides = [1, 1]} : vector<8x3xf32> to vector<8x1xf32>
    %11 = vector.broadcast %10 : vector<8x1xf32> to vector<8x384xf32>
    %12 = arith.mulf %8, %11 : vector<8x384xf32>
    %13 = arith.addf %9, %12 : vector<8x384xf32>
    %c383_i32 = arith.constant 383 : i32
    %14 = tpu.dynamic_rotate %8 by %c383_i32 dim 1 : vector<8x384xf32>, i32 -> vector<8x384xf32>
    %15 = vector.extract_strided_slice %0 {offsets = [0, 1], sizes = [8, 1], strides = [1, 1]} : vector<8x3xf32> to vector<8x1xf32>
    %16 = vector.broadcast %15 : vector<8x1xf32> to vector<8x384xf32>
    %17 = arith.mulf %14, %16 : vector<8x384xf32>
    %18 = arith.addf %13, %17 : vector<8x384xf32>
    %c382_i32 = arith.constant 382 : i32
    %19 = tpu.dynamic_rotate %8 by %c382_i32 dim 1 : vector<8x384xf32>, i32 -> vector<8x384xf32>
    %20 = vector.extract_strided_slice %0 {offsets = [0, 2], sizes = [8, 1], strides = [1, 1]} : vector<8x3xf32> to vector<8x1xf32>
    %21 = vector.broadcast %20 : vector<8x1xf32> to vector<8x384xf32>
    %22 = arith.mulf %19, %21 : vector<8x384xf32>
    %23 = arith.addf %18, %22 : vector<8x384xf32>
    %24 = vector.extract_strided_slice %23 {offsets = [0, 0], sizes = [8, 256], strides = [1, 1]} : vector<8x384xf32> to vector<8x256xf32>
    %c0_12 = arith.constant 0 : index
    %c0_13 = arith.constant 0 : index
    %c0_14 = arith.constant 0 : index
    %25 = vector.load %arg4[%c0_12, %c0_13, %c0_14] : memref<1x8x256xf32, #tpu.memory_space<vmem>>, vector<1x8x256xf32>
    %26 = vector.shape_cast %25 : vector<1x8x256xf32> to vector<8x256xf32>
    %27 = vector.shape_cast %24 : vector<8x256xf32> to vector<1x8x256xf32>
    tpu.vector_store %arg4[%c0_12, %c0_13, %c0_14], %27 {strides = array<i32>} : memref<1x8x256xf32, #tpu.memory_space<vmem>>, vector<1x8x256xf32>,
    return
  }
  func.func @transform_0(%arg0: i32, %arg1: i32) -> (i32, i32, i32) {
    %c0_i32 = arith.constant 0 : i32
    %c0_i32_0 = arith.constant 0 : i32
    return %arg1, %arg0, %c0_i32 : i32, i32, i32
  }
  func.func @transform_1(%arg0: i32, %arg1: i32) -> (i32, i32) {
    %c0_i32 = arith.constant 0 : i32
    %c0_i32_0 = arith.constant 0 : i32
    return %arg0, %c0_i32 : i32, i32
  }
  func.func @transform_2(%arg0: i32, %arg1: i32) -> (i32, i32, i32) {
    %c0_i32 = arith.constant 0 : i32
    %c0_i32_0 = arith.constant 0 : i32
    return %arg1, %arg0, %c0_i32 : i32, i32, i32
  }
}

</mosaic_0001>

<bundles_post_ra>
// kernel: tpu_custom_call.1
= control target key start
LH: loop header
LB: loop body
LE: loop exit
PB: predicated region body
PF: predicated region fallthrough
CT: control target
= control target key end

     0   :  { %7 = vsyncpa [#allocation4], 0  ;;  %s791_s0 = inlined_call_operand.hbm [shape: f32[2,8,256], index: 0, kind: input, shape index: {}]   ;;  %s792_s1 = inlined_call_operand.vmem [shape: f32[8,3], index: 1, kind: input, shape index: {}]   ;;  %s793_s2 = inlined_call_operand.hbm [shape: f32[2,8,256], index: 2, kind: output, shape index: {}]  }
   0x1   :  { %9 = vsyncpa [#allocation4 + $0x1], 0 }
   0x2   :  { %10 = vsyncpa [#allocation5], 0 }
   0x3   :  { %12 = vsyncpa [#allocation5 + $0x1], 0  ;;  %s609_s9 = smov 0   ;;  %s611_s10 = smov 0  }
   0x4   :  { %s613_s11 = smov 0   ;;  %s615_s12 = smov 0  }
   0x5   :  { %s617_s13 = smov 0   ;;  %s619_s14 = smov 0  }
   0x6 LB: > { %s381_s15 = sadd.s32 4294967295, %s583_s14   ;;  %s382_s16 = sadd.s32 4294967294, %s583_s14   ;;  %s583_s14 = sphi %s619_s14, %s18_s14   ;;  %s579_s13 = sphi %s617_s13, %s809_s13   ;;  %s575_s12 = sphi %s615_s12, %s808_s12   ;;  %s571_s11 = sphi %s613_s11, %s807_s11   ;;  %s567_s10 = sphi %s611_s10, %s806_s10   ;;  %s563_s9 = sphi %s609_s9, %s805_s9  }
   0x7   : > { %s27_s17 = sadd.s32 1, %s579_s13  ;;  %s39_s18 = sadd.s32 1, %s571_s11 }
   0x8   : > { %p28_p0 = scmp.ge.s32.totalorder %s27_s17, 2  ;;  %p46_p1 = scmp.ne.s32.totalorder %s571_s11, %s567_s10 }
   0x9   : > { %p47_p2 = scmp.eq.s32.totalorder %s583_s14, 0  ;;  %p52_p3 = scmp.ne.s32.totalorder %s567_s10, %s563_s9 }
   0xa   : > { %s811_s17 = smov (%p28_p0, %s27_s17), 0  ;;  %p53_p5 = scmp.eq.s32.totalorder %s381_s15, 0 }
   0xb   : > { %p650_p4 = por %p47_p2, %p46_p1  ;;  %s34_s20 = ssub.s32 %s579_s13, %s811_s17 }
   0xc   : > { %p104_p6 = scmp.eq.s32.totalorder %s381_s15, 1  ;;  %p37_p7 = scmp.eq.s32.totalorder %s34_s20, 0 }
   0xd   : > { %p656_p8 = por %p53_p5, %p52_p3  ;;  %p110_p10 = scmp.eq.s32.totalorder %s382_s16, 1 }
   0xe   : > { %p660_p9 = por %p104_p6, %p46_p1  ;;  %p411_p13 = scmp.lt.s32.totalorder %s583_s14, 2 }
   0xf   : > { %s665_s23 = scalar_select %p37_p7, %s571_s11, %s39_s18  }
  0x10   : > { %s797_s22 = scalar_select %p660_p9, 1, 0 }
  0x11   : > { %p667_p11 = por %p110_p10, %p52_p3  ;;  %s137_s25 = sand.u32 1, %s571_s11  }
  0x12   : > { %s386_s26 = sshll.u32 %s137_s25, 4  ;;  %s397_s27 = sshll.u32 %s579_s13, 8 }
  0x13   : > { %s798_s24 = scalar_select %p667_p11, 1, 0 }
  0x14   : > { %s678_s30 = scalar_lea.hbm %s791_s0, %s397_s27  ;;  %s141_s3 = scalar_lea.vmem [#allocation3], %s386_s26 }
  0x15   : > { %s151_s4 = sshll.u32 %s141_s3, 4  ;;  %p684_p0 = pnand %p411_p13, %p650_p4  ;;  %s680_s4 = int_to_ptr.vmem [resolvable:$true] %s151_s4 }
  0x16   : > { %s138_s6 = scalar_lea.sflag [#allocation4], %s137_s25  ;;  %s471_s7 = scalar_lea.hbm %s678_s30, 256 }
  0x17   : > { %p472_p3 = scmp.ne.s32.totalorder %s678_s30, %s471_s7  ;;  %p473_p5 = pneg %p684_p0 }
  0x18   : > { %s476_s16 = scalar_lea.hbm %s791_s0, 512  ;;  %p477_p4 = scmp.lt.u32.totalorder %s678_s30, %s791_s0 }
  0x19   : > { %p474_p6 = pnand %p473_p5, %p472_p3  ;;  %p478_p10 = scmp.lt.u32.totalorder %s476_s16, %s471_s7 }
  0x1a   : > { %p480_p12 = scmp.lt.u32.totalorder %s471_s7, %s678_s30 }
  0x1b   : > { %p475_p7 = pneg %p474_p6  ;;  %p479_p13 = por %p478_p10, %p477_p4 }
  0x1d   : > { %p481_p1 = por %p480_p12, %p479_p13 }
  0x1f   : > { %p482_p2 = pnand %p481_p1, %p475_p7 }
  0x21   : > { %485 = shalt.err (!%p482_p2)
}
  0x22   : > { %s486_s20 = scalar_lea.vmem %s680_s4, 256  ;;  %s585_s25 = smov [#allocation3]  }
  0x23   : > { %p487_p3 = scmp.ne.s32.totalorder %s680_s4, %s486_s20  ;;  %s491_s26 = sshll.u32 %s585_s25, 4  ;;  %s492_s26 = int_to_ptr.vmem [resolvable:$false] %s491_s26 }
  0x24   : > { %s493_s27 = scalar_lea.vmem %s492_s26, 512  ;;  %p494_p9 = scmp.lt.s32.totalorder %s680_s4, %s492_s26 }
  0x25   : > { %p489_p6 = pnand %p487_p3, %p473_p5  ;;  %p495_p4 = scmp.lt.s32.totalorder %s493_s27, %s486_s20 }
  0x27   : > { %p490_p11 = pneg %p489_p6  ;;  %p496_p10 = por %p495_p4, %p494_p9 }
  0x29   : > { %p497_p12 = pnand %p496_p10, %p490_p11 }
  0x2b   : > { %500 = shalt.err (!%p497_p12)
}
  0x2c   : > { %406 = dma.hbm_to_vmem [thread:$0]  (!%p684_p0), %s678_s30, 256, %s680_s4, %s138_s6  }
  0x2d   : > { %p800_p1 = scmp.lt.s32.totalorder %s583_s14, 3  ;;  %p801_p2 = scmp.ge.s32.totalorder %s583_s14, 1 }
  0x2f   : > { %p157_p5 = pnand %p801_p2, %p800_p1 }
  0x30   : > { %s720_s28 = sand.u32 (!%p157_p5), 1, %s567_s10  }
  0x31   : > { %160 = sbr.rel (%p157_p5) target bundleno = 328 (0x148), region = 28  ;;  %s390_s29 = sshll.u32 (!%p157_p5), %s720_s28, 4 }
  0x32   : > { %s163_s3 = scalar_lea.sflag (!%p157_p5), [#allocation4], %s720_s28  ;;  %s166_s5 = scalar_lea.vmem (!%p157_p5), [#allocation3], %s390_s29 }
  0x38   : > { %554 = dma.done.wait (%p656_p8), %s163_s3, 256  }
  0x39   : > { %556 = vsyncadd (%p656_p8), %s163_s3, 4294967040  ;;  %vm196_vm0 = vcmask 7168   ;;  %v586_v0 = vmov 0   ;;  %v587_v1 = vmov 2   ;;  %v588_v2 = vmov 0.0   ;;  %v198_v3 = vld [vmem:[%s166_s5] sm:$0xff] }
  0x3a   : > { %468 = vset.pattern.permute.xlu1 %v586_v0  ;;  %470 = vset.pattern.permute.xlu0 %v587_v1  ;;  %197 = vst.msk [vmem:[#allocation2] sm:$0xff] %vm196_vm0, %v588_v2  ;;  %v195_v4 = vld [vmem:[%s792_s1] sm:$0xff]  ;;  %s589_s6 = smov 1   ;;  %v590_v6 = vmov 1   ;;  %vm210_vm1 = vcmask 1047560   ;;  %s591_s21 = smov 127   ;;  %v233_v14 = vlaneseq }
  0x3b   : > { %202 = vrot.lane.b32.xlu0 %v198_v3, %s589_s6  ;;  %220 = vperm.xlu1 %468, %v195_v4   ;;  %v199_v5 = vld [vmem:[%s166_s5 + $0x8] sm:$0xff]  ;;  %s592_s7 = smov 126   ;;  %s398_s8 = sshll.u32 %s575_s12, 8 }
  0x3c   : > { %v234_v17 = vand.u32 127, %v233_v14  ;;  %s190_s15 = scalar_lea.vmem [#allocation6], %s390_s29  ;;  %s742_s20 = scalar_lea.hbm %s793_s2, %s398_s8 }
  0x3d   : > { %s282_s16 = sshll.u32 %s190_s15, 4  ;;  %s266_s12 = scalar_lea.sflag [#allocation5], %s720_s28  ;;  %s744_s16 = int_to_ptr.vmem [resolvable:$true] %s282_s16 }
  0x3e   : > { %vm235_vm2 = vcmp.lt.s32.totalorder %v234_v17, 127  ;;  %vm252_vm3 = vcmp.lt.s32.totalorder %v234_v17, 126  ;;  %s501_s25 = scalar_lea.vmem %s744_s16, 256  ;;  %p802_p9 = scmp.ne.s32.totalorder %s797_s22, 0 }
  0x3f   : > { %204 = vrot.lane.b32.xlu0 %v199_v5, %s589_s6  ;;  %469 = vset.pattern.permute.xlu1 %v590_v6  ;;  %p502_p8 = scmp.ne.s32.totalorder %s744_s16, %s501_s25  ;;  %s593_s26 = smov [#allocation6]  }
  0x40   : > { %239 = vperm.xlu1 %469, %v195_v4   ;;  %s505_s27 = sshll.u32 %s593_s26, 4  ;;  %s506_s27 = int_to_ptr.vmem [resolvable:$false] %s505_s27 }
  0x41   : > { %p503_p11 = pnand %p502_p8, %p802_p9  ;;  %s507_s29 = scalar_lea.vmem %s506_s27, 512 }
  0x42   : > { %p508_p7 = scmp.lt.s32.totalorder %s744_s16, %s506_s27  ;;  %p509_p13 = scmp.lt.s32.totalorder %s507_s29, %s501_s25 }
  0x43   : > { %256 = vperm.xlu0 %470, %v195_v4   ;;  %p504_p0 = pneg %p503_p11 }
  0x44   : > { %p510_p3 = por %p509_p13, %p508_p7 }
  0x46   : > { %p511_p6 = pnand %p510_p3, %p504_p0 }
  0xad   : > { %v203_v7 = vpop.permute.xlu0 %202 }
  0xae   : > { %211 = vst.msk [vmem:[#allocation2] sm:$0xff] %vm210_vm1, %v203_v7 }
  0xb1   : > { %v205_v8 = vpop.permute.xlu0 %204 }
  0xb2   : > { %v206_v9 = vsel %vm196_vm0, %v203_v7, %v205_v8  ;;  %213 = vst.msk [vmem:[#allocation2 + $0x10] sm:$0xff] %vm196_vm0, %v205_v8 }
  0xb3   : > { %214 = vst.msk [vmem:[#allocation2 + $0x10] sm:$0xff] %vm210_vm1, %v588_v2 }
  0xb5   : > { %v215_v10 = vld [vmem:[#allocation2] sm:$0xff] }
  0xb6   : > { %227 = vrot.lane.b32.xlu1 %v215_v10, %s591_s21 }
  0xba   : > { %246 = vrot.lane.b32.xlu1 %v215_v10, %s592_s7  ;;  %v217_v11 = vld [vmem:[#allocation2 + $0x10] sm:$0xff]  ;;  %v221_v12 = vpop.permute.xlu1 %220 }
  0xbb   : > { %231 = vrot.lane.b32.xlu0 %v217_v11, %s591_s21  ;;  %v223_v24 = vmul.f32 %v221_v12, %v215_v10  ;;  %v224_v29 = vmul.f32 %v221_v12, %v206_v9 }
  0xbe   : > { %229 = vrot.lane.b32.xlu1 %v206_v9, %s591_s21 }
  0xbf   : > { %248 = vrot.lane.b32.xlu0 %v206_v9, %s592_s7  ;;  %v240_v13 = vpop.permute.xlu1 %239 }
  0xc2   : > { %250 = vrot.lane.b32.xlu1 %v217_v11, %s592_s7  ;;  %v257_v15 = vpop.permute.xlu0 %256 }
 0x128   : > { %v228_v16 = vpop.permute.xlu1 %227 }
 0x12c   : > { %v247_v18 = vpop.permute.xlu1 %246 }
 0x12d   : > { %v232_v19 = vpop.permute.xlu0 %231 }
 0x130   : > { %v230_v20 = vpop.permute.xlu1 %229 }
 0x131   : > { %v236_v21 = vsel %vm235_vm2, %v230_v20, %v232_v19  ;;  %v237_v22 = vsel %vm235_vm2, %v228_v16, %v230_v20  ;;  %v249_v23 = vpop.permute.xlu0 %248 }
 0x132   : > { %v242_v25 = vmul.f32 %v240_v13, %v237_v22  ;;  %v243_v26 = vmul.f32 %v240_v13, %v236_v21  ;;  %v254_v27 = vsel %vm252_vm3, %v247_v18, %v249_v23 }
 0x133   : > { %v259_v28 = vmul.f32 %v257_v15, %v254_v27 }
 0x134   : > { %v244_v30 = vadd.f32 %v242_v25, %v223_v24  ;;  %v251_v31 = vpop.permute.xlu1 %250  ;;  %v245_v33 = vadd.f32 %v243_v26, %v224_v29 }
 0x135   : > { %v253_v32 = vsel %vm252_vm3, %v249_v23, %v251_v31 }
 0x136   : > { %v261_v34 = vadd.f32 %v259_v28, %v244_v30  ;;  %v260_v35 = vmul.f32 %v257_v15, %v253_v32 }
 0x138   : > { %v262_v36 = vadd.f32 %v260_v35, %v245_v33  ;;  %263 = vst [vmem:[%s190_s15] sm:$0xff] %v261_v34 }
 0x13a   : > { %264 = vst [vmem:[%s190_s15 + $0x8] sm:$0xff] %v262_v36 }
 0x13b   : > { %514 = shalt.err (!%p511_p6)
}
 0x13c   : > { %s515_s28 = scalar_lea.hbm %s742_s20, 256  ;;  %s519_s30 = scalar_lea.hbm %s793_s2, 512 }
 0x13d   : > { %p516_p4 = scmp.ne.s32.totalorder %s742_s20, %s515_s28  ;;  %p520_p1 = scmp.lt.u32.totalorder %s742_s20, %s793_s2 }
 0x13e   : > { %p521_p2 = scmp.lt.u32.totalorder %s519_s30, %s515_s28  ;;  %p523_p8 = scmp.lt.u32.totalorder %s515_s28, %s742_s20 }
 0x13f   : > { %p517_p10 = pnand %p516_p4, %p802_p9 }
 0x140   : > { %p522_p5 = por %p521_p2, %p520_p1 }
 0x141   : > { %p518_p12 = pneg %p517_p10 }
 0x142   : > { %p524_p11 = por %p523_p8, %p522_p5 }
 0x144   : > { %p525_p0 = pnand %p524_p11, %p518_p12 }
 0x146   : > { %528 = shalt.err (!%p525_p0)
}
 0x147   : > { %401 = dma.vmem_to_hbm [thread:$0]  (%p802_p9), %s744_s16, 256, %s742_s20, %s266_s12  }
 0x148 PF: > { %s294_s21 = sand.u32 1, %s563_s9   ;;  %p803_p7 = scmp.ne.s32.totalorder %s798_s24, 0 }
 0x149   : > { %p804_p13 = scmp.ge.s32.totalorder %s583_s14, 2  ;;  %s295_s7 = scalar_lea.sflag [#allocation5], %s294_s21 }
 0x14b   : > { %p408_p3 = pnand %p804_p13, %p803_p7 }
 0x14d   : > { %558 = dma.done.wait (!%p408_p3), %s295_s7, 256  }
 0x14e   : > { %560 = vsyncadd (!%p408_p3), %s295_s7, 4294967040  ;;  %s18_s14 = sadd.s32 1, %s583_s14   ;;  %s805_s9 = smov %s567_s10 }
 0x14f   : > { %p15_p6 = scmp.ge.s32.totalorder %s18_s14, 4   ;;  %s806_s10 = smov %s571_s11 }
 0x150   : > { %s807_s11 = smov %s665_s23  ;;  %s808_s12 = smov %s579_s13 }
 0x151   : > { %s809_s13 = smov %s811_s17  ;;  %17 = sbr.rel (!%p15_p6) target bundleno = 6 (0x6), region = 76 }
 0x158   :  { %300 = vsyncpa [#allocation4], 1 }
 0x159   :  { %302 = vsyncpa [#allocation4 + $0x1], 1 }
 0x15a   :  { %303 = vsyncpa [#allocation5], 1 }
 0x15b   :  { %305 = vsyncpa [#allocation5 + $0x1], 1 }

</bundles_post_ra>
